<compile_context>
chip_gen: v5e
topology: v5e:2x2
jax: 0.10.0
libtpu: 0.0.40
codegen_flags: <defaults>
</compile_context>

<pallas_src>
import functools

import jax
import jax.numpy as jnp
from jax import lax
from jax.experimental import pallas as pl
from jax.experimental.pallas import tpu as pltpu

LANES = 128


def _cdiv(a: int, b: int) -> int:
    return -(-a // b)


def _round_up(a: int, b: int) -> int:
    return _cdiv(a, b) * b


def _tpu_config():
    """Per-generation tiling knobs (conservative fallback if query fails)."""
    kind = ""
    try:
        kind = jax.devices()[0].device_kind.lower()
    except Exception:
        pass
    if "v7" in kind:
        # 2 TensorCores/chip but only 64 MiB VMEM: keep both cores via the
        # 'parallel' axis, keep blocks modest and VMEM headroom.
        return {"partitions": 2, "max_tile_rows": 4096, "vmem_limit": 40 * 1024 * 1024}
    if "v6" in kind:
        # Single TC, 128 MiB physical VMEM: big blocks amortize per-step overhead.
        return {"partitions": 1, "max_tile_rows": 8192, "vmem_limit": 64 * 1024 * 1024}
    if "v4" in kind or "v5p" in kind:
        # Megacore chips: 2 cores share the grid via the 'parallel' axis.
        return {"partitions": 2, "max_tile_rows": 4096, "vmem_limit": 32 * 1024 * 1024}
    # v5e / unknown: single TC, conservative defaults.
    return {"partitions": 1, "max_tile_rows": 4096, "vmem_limit": 32 * 1024 * 1024}


def _bce_partial_kernel(x_ref, t_ref, o_ref, *, tile_rows, inner_steps,
                        full_rows, rem, needs_mask):
    p = pl.program_id(0)   # partition ("parallel")
    i = pl.program_id(1)   # reduction step ("arbitrary")

    @pl.when(i == 0)
    def _init():
        o_ref[...] = jnp.zeros_like(o_ref)

    def _partial(valid_mask):
        x = x_ref[...].astype(jnp.float32)
        t = t_ref[...].astype(jnp.float32)
        # Numerically stable BCE-with-logits (same formulation PyTorch uses):
        #   loss = max(x, 0) - x * t + log(1 + exp(-|x|))
        loss = jnp.maximum(x, 0.0) - x * t + jnp.log1p(jnp.exp(-jnp.abs(x)))
        if valid_mask is not None:
            # select (not multiply) so garbage in the padded tail cannot leak NaN/Inf.
            loss = jnp.where(valid_mask, loss, 0.0)
        # Sublane-aligned partial reduce (tile_rows,128) -> (8,128): pure VPU adds,
        # keeps the resident accumulator vreg-shaped.
        # TODO(synk): if bundle dump shows this reshape materializing a VMEM copy,
        # switch to an unrolled fori_loop over pl.ds(j*8, 8) slabs.
        return loss.reshape(tile_rows // 8, 8, LANES).sum(axis=0)

    start_row = (p * inner_steps + i) * tile_rows

    if not needs_mask:
        o_ref[...] += _partial(None)
    else:
        # Interior blocks (every element valid) take the unmasked fast path;
        # only the tail block per partition pays the mask cost.
        interior = start_row + tile_rows <= full_rows

        @pl.when(interior)
        def _fast():
            o_ref[...] += _partial(None)

        @pl.when(jnp.logical_not(interior))
        def _tail():
            row_ids = start_row + lax.broadcasted_iota(
                jnp.int32, (tile_rows, LANES), 0)
            valid = row_ids < full_rows
            if rem:
                col_ids = lax.broadcasted_iota(jnp.int32, (tile_rows, LANES), 1)
                valid = valid | ((row_ids == full_rows) & (col_ids < rem))
            o_ref[...] += _partial(valid)


def bce_with_logits_mean(logits: jax.Array, targets: jax.Array) -> jax.Array:
    """Mean binary cross entropy with logits over all elements
    (== torch.nn.functional.binary_cross_entropy_with_logits, reduction='mean')."""
    assert logits.shape == targets.shape, (logits.shape, targets.shape)
    total_n = int(logits.size)
    cfg = _tpu_config()

    x = logits.reshape(-1)
    t = targets.reshape(-1)

    rem = total_n % LANES            # valid lanes in the last (partial) row
    full_rows = total_n // LANES     # rows that are fully valid
    rows = full_rows + (1 if rem else 0)
    if rem:
        # Tiny (<128-element) pad purely so the flat array can be viewed as a
        # lane-dense [rows, 128] slab; the padded tail is masked in-kernel, so
        # the pad values are irrelevant.  Aligned inputs take zero-copy reshape.
        pad = LANES - rem
        x = jnp.pad(x, (0, pad))
        t = jnp.pad(t, (0, pad))

    x2 = x.reshape(rows, LANES)
    t2 = t.reshape(rows, LANES)

    partitions = cfg["partitions"] if rows >= 16 else 1
    inner_steps = _cdiv(rows, partitions * cfg["max_tile_rows"])
    tile_rows = _round_up(_cdiv(rows, partitions * inner_steps), 8)
    last_block = _cdiv(rows, tile_rows) - 1     # last valid block index along rows
    needs_mask = (partitions * inner_steps * tile_rows != rows) or (rem != 0)

    kernel = functools.partial(
        _bce_partial_kernel,
        tile_rows=tile_rows,
        inner_steps=inner_steps,
        full_rows=full_rows,
        rem=rem,
        needs_mask=needs_mask,
    )

    # Clamp to the last in-bounds block so logical blocks past the end never issue
    # an out-of-bounds DMA; their contribution is fully masked in-kernel anyway.
    def in_idx(p, i):
        return (jnp.minimum(p * inner_steps + i, last_block), 0)

    bytes_in = x2.size * x2.dtype.itemsize + t2.size * t2.dtype.itemsize
    cost = pl.CostEstimate(
        flops=6 * rows * LANES,
        transcendentals=2 * rows * LANES,
        bytes_accessed=bytes_in + partitions * 8 * LANES * 4,
    )

    partial_sums = pl.pallas_call(
        kernel,
        out_shape=jax.ShapeDtypeStruct((partitions * 8, LANES), jnp.float32),
        grid_spec=pltpu.PrefetchScalarGridSpec(
            num_scalar_prefetch=0,
            grid=(partitions, inner_steps),
            in_specs=[
                pl.BlockSpec((tile_rows, LANES), in_idx),
                pl.BlockSpec((tile_rows, LANES), in_idx),
            ],
            out_specs=pl.BlockSpec((8, LANES), lambda p, i: (p, 0)),
        ),
        compiler_params=pltpu.CompilerParams(
            dimension_semantics=("parallel", "arbitrary"),
            vmem_limit_bytes=cfg["vmem_limit"],
        ),
        cost_estimate=cost,
    )(x2, t2)

    # Single cross-lane reduction of the per-partition vreg partials, then mean.
    return jnp.sum(partial_sums) / jnp.float32(total_n)


class CrossEntropyPallas:
    """Mirror of the PyTorch `CrossEntropy` module.

    NOTE: despite the name, the original module is binary_cross_entropy_with_logits
    with 'mean' reduction — NOT softmax cross entropy.
    """

    def __call__(self, **kwargs):
        return bce_with_logits_mean(kwargs["input"], kwargs["target"])


def _reference(logits, targets):
    lf = logits.astype(jnp.float32)
    tf = targets.astype(jnp.float32)
    return jnp.mean(jnp.maximum(lf, 0.0) - lf * tf + jnp.log1p(jnp.exp(-jnp.abs(lf))))


if __name__ == "__main__":
    key = jax.random.PRNGKey(0)
    loss_fn = CrossEntropyPallas()

    # Small NCHW shapes consistent with a segmentation-style BCE loss.
    k1, k2, k3, k4 = jax.random.split(key, 4)
    B, C, H, W = 2, 4, 16, 16
    logits = jax.random.normal(k1, (B, C, H, W), dtype=jnp.float32)
    targets = jax.random.bernoulli(k2, p=0.5, shape=(B, C, H, W)).astype(jnp.float32)

    loss = jax.block_until_ready(loss_fn(input=logits, target=targets))
    ref = _reference(logits, targets)
    assert jnp.allclose(loss, ref, rtol=1e-5, atol=1e-6), (loss, ref)

    # General (non-128-divisible) shape to exercise the in-kernel tail masking path.
    logits2 = jax.random.normal(k3, (3, 5, 7, 11), dtype=jnp.float32)
    targets2 = jax.random.bernoulli(k4, p=0.5, shape=(3, 5, 7, 11)).astype(jnp.float32)
    loss2 = jax.block_until_ready(loss_fn(input=logits2, target=targets2))
    ref2 = _reference(logits2, targets2)
    assert jnp.allclose(loss2, ref2, rtol=1e-5, atol=1e-6), (loss2, ref2)

    print("KERNEL_OK")
</pallas_src>

<mosaic_0001>
module attributes {stable_mosaic.version = 11 : i64} {
  func.func @_bce_partial_kernel(%arg0: i32, %arg1: i32, %arg2: memref<16x128xf32, #tpu.memory_space<vmem>>, %arg3: memref<16x128xf32, #tpu.memory_space<vmem>>, %arg4: memref<8x128xf32, #tpu.memory_space<vmem>>) attributes {dimension_semantics = [#tpu.dimension_semantics<parallel>, #tpu.dimension_semantics<arbitrary>], iteration_bounds = array<i64: 1, 1>, scalar_prefetch = 0 : i64, scratch_operands = 0 : i64, tpu.core_type = #tpu.core_type<tc>, window_params = [{transform_indices = @transform_0, window_bounds = array<i64: 16, 128>}, {transform_indices = @transform_1, window_bounds = array<i64: 16, 128>}, {transform_indices = @transform_2, window_bounds = array<i64: 8, 128>}]} {
    %c0_i32 = arith.constant 0 : i32
    %0 = arith.cmpi eq, %arg1, %c0_i32 : i32
    %1 = arith.extui %0 : i1 to i32
    %c0_i32_0 = arith.constant 0 : i32
    %2 = arith.cmpi ne, %1, %c0_i32_0 : i32
    scf.if %2 {
      %cst_10 = arith.constant 0.000000e+00 : f32
      %20 = vector.broadcast %cst_10 : f32 to vector<8x128xf32>
      %c0_11 = arith.constant 0 : index
      %c0_12 = arith.constant 0 : index
      %21 = vector.load %arg4[%c0_11, %c0_12] : memref<8x128xf32, #tpu.memory_space<vmem>>, vector<8x128xf32>
      tpu.vector_store %arg4[%c0_11, %c0_12], %20 {strides = array<i32>} : memref<8x128xf32, #tpu.memory_space<vmem>>, vector<8x128xf32>,
    } else {
    }
    %c0 = arith.constant 0 : index
    %c0_1 = arith.constant 0 : index
    %3 = vector.load %arg4[%c0, %c0_1] : memref<8x128xf32, #tpu.memory_space<vmem>>, vector<8x128xf32>
    %c0_2 = arith.constant 0 : index
    %c0_3 = arith.constant 0 : index
    %4 = vector.load %arg2[%c0_2, %c0_3] : memref<16x128xf32, #tpu.memory_space<vmem>>, vector<16x128xf32>
    %c0_4 = arith.constant 0 : index
    %c0_5 = arith.constant 0 : index
    %5 = vector.load %arg3[%c0_4, %c0_5] : memref<16x128xf32, #tpu.memory_space<vmem>>, vector<16x128xf32>
    %cst = arith.constant 0.000000e+00 : f32
    %6 = vector.broadcast %cst : f32 to vector<16x128xf32>
    %7 = arith.maximumf %4, %6 : vector<16x128xf32>
    %8 = arith.mulf %4, %5 : vector<16x128xf32>
    %9 = arith.subf %7, %8 : vector<16x128xf32>
    %10 = math.absf %4 : vector<16x128xf32>
    %cst_6 = arith.constant 0.000000e+00 : f32
    %11 = vector.broadcast %cst_6 : f32 to vector<16x128xf32>
    %12 = arith.subf %11, %10 : vector<16x128xf32>
    %13 = math.exp %12 : vector<16x128xf32>
    %14 = math.log1p %13 : vector<16x128xf32>
    %15 = arith.addf %9, %14 : vector<16x128xf32>
    %16 = vector.shape_cast %15 : vector<16x128xf32> to vector<2x8x128xf32>
    %cst_7 = arith.constant dense<0.000000e+00> : vector<8x128xf32>
    %17 = vector.multi_reduction <add>, %16, %cst_7 [0] : vector<2x8x128xf32> to vector<8x128xf32>
    %18 = arith.addf %3, %17 : vector<8x128xf32>
    %c0_8 = arith.constant 0 : index
    %c0_9 = arith.constant 0 : index
    %19 = vector.load %arg4[%c0_8, %c0_9] : memref<8x128xf32, #tpu.memory_space<vmem>>, vector<8x128xf32>
    tpu.vector_store %arg4[%c0_8, %c0_9], %18 {strides = array<i32>} : memref<8x128xf32, #tpu.memory_space<vmem>>, vector<8x128xf32>,
    return
  }
  func.func @transform_0(%arg0: i32, %arg1: i32) -> (i32, i32) {
    %c1_i32 = arith.constant 1 : i32
    %0 = arith.muli %arg0, %c1_i32 : i32
    %1 = arith.addi %0, %arg1 : i32
    %c0_i32 = arith.constant 0 : i32
    %2 = arith.minsi %1, %c0_i32 : i32
    %c0_i32_0 = arith.constant 0 : i32
    %c0_i32_1 = arith.constant 0 : i32
    return %2, %c0_i32_0 : i32, i32
  }
  func.func @transform_1(%arg0: i32, %arg1: i32) -> (i32, i32) {
    %c1_i32 = arith.constant 1 : i32
    %0 = arith.muli %arg0, %c1_i32 : i32
    %1 = arith.addi %0, %arg1 : i32
    %c0_i32 = arith.constant 0 : i32
    %2 = arith.minsi %1, %c0_i32 : i32
    %c0_i32_0 = arith.constant 0 : i32
    %c0_i32_1 = arith.constant 0 : i32
    return %2, %c0_i32_0 : i32, i32
  }
  func.func @transform_2(%arg0: i32, %arg1: i32) -> (i32, i32) {
    %c0_i32 = arith.constant 0 : i32
    %c0_i32_0 = arith.constant 0 : i32
    return %arg0, %c0_i32 : i32, i32
  }
}

</mosaic_0001>

<bundles_post_ra>
// kernel: tpu_custom_call.1
= control target key start
LH: loop header
LB: loop body
LE: loop exit
PB: predicated region body
PF: predicated region fallthrough
CT: control target
= control target key end

     0   :  { %7 = vsyncpa [#allocation3], 0  ;;  %s254_s0 = inlined_call_operand.hbm [shape: f32[16,128], index: 0, kind: input, shape index: {}]   ;;  %s255_s1 = inlined_call_operand.hbm [shape: f32[16,128], index: 1, kind: input, shape index: {}]   ;;  %s256_s2 = inlined_call_operand.hbm [shape: f32[8,128], index: 2, kind: output, shape index: {}]  }
   0x1   :  { %8 = vsyncpa [#allocation6], 0 }
   0x2   :  { %9 = vsyncpa [#allocation4], 0  ;;  %s20_s11 = sshll.u32 %s254_s0, 4  ;;  %s225_s12 = smov [#allocation2]   ;;  %s21_s11 = int_to_ptr.hbm [resolvable:$true] %s20_s11 }
   0x3   :  { %s22_s13 = sshll.u32 %s225_s12, 4  ;;  %s39_s16 = sshll.u32 %s255_s1, 4  ;;  %s23_s13 = int_to_ptr.vmem [resolvable:$true] %s22_s13  ;;  %s40_s16 = int_to_ptr.hbm [resolvable:$true] %s39_s16 }
   0x4   :  { %s226_s17 = smov 128   ;;  %s227_s18 = smov 8  }
   0x5   :  { %28 = dma.hbm_to_vmem [thread:$0]  %s21_s11, 256, %s23_s13, [#allocation3], %s226_s17, %s226_s17, %s227_s18  }
   0x6   :  { %s228_s19 = smov [#allocation5]  }
   0x7   :  { %s41_s20 = sshll.u32 %s228_s19, 4  ;;  %s42_s20 = int_to_ptr.vmem [resolvable:$true] %s41_s20 }
   0x8   :  { %47 = dma.hbm_to_vmem [thread:$0]  %s40_s16, 256, %s42_s20, [#allocation6], %s226_s17, %s226_s17, %s227_s18  }
   0x9   :  { %219 = dma.done.wait [#allocation3], 256  }
   0xa   :  { %220 = vsyncadd [#allocation3], 4294967040 }
   0xb   :  { %221 = dma.done.wait [#allocation6], 256  }
   0xc   :  { %222 = vsyncadd [#allocation6], 4294967040  ;;  %v70_v0 = vld [vmem:[#allocation2] sm:$0xff]  ;;  %v71_v1 = vld [vmem:[#allocation2 + $0x8] sm:$0xff]  ;;  %s229_s0 = smov [#allocation7]   ;;  %s118_s23 = sshll.u32 %s256_s2, 4  ;;  %s119_s23 = int_to_ptr.hbm [resolvable:$true] %s118_s23 }
   0xd   :  { %v80_v2 = vand.u32 2147483647, %v70_v0  ;;  %v81_v3 = vand.u32 2147483647, %v71_v1  ;;  %v72_v12 = vld [vmem:[#allocation5] sm:$0xff]  ;;  %v73_v15 = vld [vmem:[#allocation5 + $0x8] sm:$0xff] }
   0xe   :  { %v74_v17 = vmax.f32 %v70_v0, 0.0  ;;  %v76_v18 = vmul.f32 %v72_v12, %v70_v0  ;;  %v75_v21 = vmax.f32 %v71_v1, 0.0  ;;  %v77_v22 = vmul.f32 %v73_v15, %v71_v1  ;;  %s116_s1 = sshll.u32 %s229_s0, 4  ;;  %s117_s1 = int_to_ptr.vmem [resolvable:$true] %s116_s1 }
   0xf   :  { %v82_v4 = vsub.f32 0.0, %v80_v2  ;;  %v83_v5 = vsub.f32 0.0, %v81_v3 }
  0x10   :  { %v78_v26 = vsub.f32 %v74_v17, %v76_v18  ;;  %v79_v29 = vsub.f32 %v75_v21, %v77_v22 }
  0x11   :  { %v84_v6 = vmul.f32 1.442695, %v82_v4  ;;  %v86_v7 = vmul.f32 1.442695, %v83_v5 }
  0x13   :  { %139 = vpow2.f32 %v84_v6 }
  0x14   :  { %141 = vpow2.f32 %v86_v7 }
  0x19   :  { %v140_v8 = vpop.eup %139 }
  0x1a   :  { %v142_v9 = vpop.eup %141  ;;  %v88_v10 = vadd.f32 1.0, %v140_v8  ;;  %v91_v11 = vmul.f32 -0.5, %v140_v8  ;;  %v94_v19 = vand.u32 2147483647, %v140_v8 }
  0x1b   :  { %v97_v13 = vadd.f32 1.0, %v142_v9  ;;  %v100_v14 = vmul.f32 -0.5, %v142_v9  ;;  %v103_v23 = vand.u32 2147483647, %v142_v9 }
  0x1c   :  { %143 = vlog2.f32 %v88_v10  ;;  %v92_v16 = vadd.f32 1.0, %v91_v11  ;;  %vm95_vm0 = vcmp.lt.f32.partialorder %v94_v19, 0.0004427343 }
  0x1d   :  { %145 = vlog2.f32 %v97_v13  ;;  %v101_v20 = vadd.f32 1.0, %v100_v14  ;;  %vm104_vm1 = vcmp.lt.f32.partialorder %v103_v23, 0.0004427343 }
  0x1e   :  { %v93_v24 = vmul.f32 %v140_v8, %v92_v16 }
  0x1f   :  { %v102_v27 = vmul.f32 %v142_v9, %v101_v20 }
  0x22   :  { %v144_v25 = vpop.eup %143 }
  0x23   :  { %v146_v28 = vpop.eup %145  ;;  %v90_v30 = vmul.f32 0.6931472, %v144_v25 }
  0x24   :  { %v99_v31 = vmul.f32 0.6931472, %v146_v28 }
  0x25   :  { %v96_v32 = vsel %vm95_vm0, %v93_v24, %v90_v30 }
  0x26   :  { %v105_v33 = vsel %vm104_vm1, %v102_v27, %v99_v31  ;;  %v106_v34 = vadd.f32 %v96_v32, %v78_v26 }
  0x27   :  { %v107_v35 = vadd.f32 %v105_v33, %v79_v29 }
  0x29   :  { %v108_v36 = vadd.f32 %v107_v35, %v106_v34 }
  0x2b   :  { %110 = vst [vmem:[#allocation7] sm:$0xff] %v108_v36 }
  0x2c   :  { %121 = dma.vmem_to_hbm [thread:$0]  %s117_s1, 128, %s119_s23, [#allocation4]  }
  0x2d   :  { %223 = dma.done.wait [#allocation4], 128  }
  0x2e   :  { %224 = vsyncadd [#allocation4], 4294967168 }
  0x2f   :  { %126 = vsyncpa [#allocation3], 1 }
  0x30   :  { %127 = vsyncpa [#allocation6], 1 }
  0x31   :  { %128 = vsyncpa [#allocation4], 1 }

</bundles_post_ra>
